<compile_context>
chip_gen: v6e
topology: v6e:2x2x1
jax: 0.10.0
libtpu: 0.0.40
codegen_flags: <defaults>
</compile_context>

<pallas_src>
import functools

import jax
import jax.numpy as jnp
from jax.experimental import pallas as pl
from jax.experimental.pallas import tpu as pltpu


def _beans_kernel(x_ref,
                  w1, t1, w2, t2, w3, t3, w4, t4,
                  w5, b5,
                  out_ref,
                  *, inv_temperature, compute_dtype):
    """Fused forward pass for one batch tile.  Weights/shifts are VMEM-resident."""
    h = x_ref[...].astype(compute_dtype)      # cast in-kernel; wrapper keeps x in f32

    def lin_relu(h, w_ref, t_ref):
        # Linear with BN(inference) + bias folded into (w, t): relu(h @ w + t).
        z = jnp.dot(h, w_ref[...], preferred_element_type=jnp.float32)
        z = z + t_ref[...]
        return jnp.maximum(z, 0.0).astype(compute_dtype)

    h = lin_relu(h, w1, t1)          # fc1 -> bn1 -> relu
    h = lin_relu(h, w2, t2)          # fc2 -> bn2 -> relu (+dropout p=0.001 = identity)
    h = lin_relu(h, w3, t3)          # fc3 -> bn3 -> relu (+dropout = identity)
    h = lin_relu(h, w4, t4)          # fc4 -> bn4 -> relu

    logits = jnp.dot(h, w5[...], preferred_element_type=jnp.float32) + b5[...]

    # softmax(logits / temperature, dim=1) — stable, EXACT division (the approx
    # reciprocal previously broke sum(probs)==1 within 1e-3).
    z = logits * inv_temperature
    m = jnp.max(z, axis=1, keepdims=True)
    e = jnp.exp(z - m)
    probs = e / jnp.sum(e, axis=1, keepdims=True)

    # One packed output stream per tile: [logits | probs] along the class axis.
    out_ref[...] = jnp.concatenate([logits, probs], axis=1)


def init_params(key, input_dim, num_classes):
    """Deterministic synthetic parameters matching the PyTorch module shapes."""
    dims = [input_dim, 128, 64, 32, 16, num_classes]
    params = {}
    for i in range(5):
        k_w, k_b, key = jax.random.split(key, 3)
        fan_in, fan_out = dims[i], dims[i + 1]
        bound = 1.0 / jnp.sqrt(fan_in)
        # PyTorch nn.Linear stores weight as [out, in]; keep that convention here.
        params[f"fc{i+1}_w"] = jax.random.uniform(
            k_w, (fan_out, fan_in), jnp.float32, -bound, bound)
        params[f"fc{i+1}_b"] = jax.random.uniform(
            k_b, (fan_out,), jnp.float32, -bound, bound)
    for i in range(4):
        n = dims[i + 1]
        k_g, k_be, k_m, k_v, key = jax.random.split(key, 5)
        params[f"bn{i+1}_gamma"] = 1.0 + 0.1 * jax.random.normal(k_g, (n,), jnp.float32)
        params[f"bn{i+1}_beta"] = 0.1 * jax.random.normal(k_be, (n,), jnp.float32)
        params[f"bn{i+1}_mean"] = 0.1 * jax.random.normal(k_m, (n,), jnp.float32)
        params[f"bn{i+1}_var"] = jnp.abs(
            1.0 + 0.1 * jax.random.normal(k_v, (n,), jnp.float32))
    return params


def _round_up(n, m):
    return ((n + m - 1) // m) * m


def _choose_num_tiles(B, max_tile_b):
    # As few grid steps as possible (each costs ~0.35us of pipeline overhead),
    # but >=2 tiles once B is large so both of v7x's TensorCores get work.
    if B <= min(1024, max_tile_b):
        return 1
    return max(2, pl.cdiv(B, max_tile_b))


def beans_forward(x, params, num_classes, temperature=1.0, eps=1e-5,
                  compute_dtype=jnp.float32, max_tile_b=4096):
    """compute_dtype=jnp.bfloat16 selects the native MXU datapath on v6e/v7x
    (footprint reduction only at these widths); keep float32 on v5e / for accuracy."""
    B, F = x.shape
    C = num_classes

    # --- plain-JAX glue: fold BN (inference) + Linear bias into weight/shift ---
    weights, shifts = [], []
    for i in range(1, 5):
        scale = params[f"bn{i}_gamma"] * jax.lax.rsqrt(params[f"bn{i}_var"] + eps)
        w = (params[f"fc{i}_w"].T * scale[None, :]).astype(compute_dtype)   # [in, out]
        shift = (params[f"fc{i}_b"] * scale
                 + params[f"bn{i}_beta"] - params[f"bn{i}_mean"] * scale)
        weights.append(w)
        shifts.append(shift[None, :].astype(jnp.float32))
    w5 = params["fc5_w"].T.astype(compute_dtype)
    b5 = params["fc5_b"][None, :].astype(jnp.float32)

    # --- batch tiling: few large tiles, 8-aligned, zero-pad the tail ---
    nb = _choose_num_tiles(B, max_tile_b)
    tile_b = _round_up(pl.cdiv(B, nb), 8)
    B_pad = nb * tile_b
    if B_pad != B:
        x = jnp.pad(x, ((0, B_pad - B), (0, 0)))   # zero rows stay finite thru softmax
    # NOTE: no wrapper-side cast of x — the kernel casts after the DMA.

    def const_spec(arr):
        return pl.BlockSpec(arr.shape, lambda i: (0, 0))    # DMA'd once, VMEM-resident

    in_specs = [pl.BlockSpec((tile_b, F), lambda i: (i, 0))]
    kernel_args = [x]
    for w, t in zip(weights, shifts):
        in_specs += [const_spec(w), const_spec(t)]
        kernel_args += [w, t]
    in_specs += [const_spec(w5), const_spec(b5)]
    kernel_args += [w5, b5]

    out_spec = pl.BlockSpec((tile_b, 2 * C), lambda i: (i, 0))

    # VMEM budget: double-buffered x/out blocks (lane-padded to 128) plus headroom
    # for in-kernel activation slabs; cap at 48 MiB (v7x has 64 MiB physical).
    lane_pad = lambda n: _round_up(n, 128)
    io_bytes = 4 * tile_b * (lane_pad(F) + lane_pad(2 * C)) * 2
    act_bytes = 4 * tile_b * 128 * 8
    vmem_limit = int(min(max(32 * 1024 * 1024, io_bytes + act_bytes),
                         48 * 1024 * 1024))

    packed = pl.pallas_call(
        functools.partial(_beans_kernel,
                          inv_temperature=float(1.0 / temperature),
                          compute_dtype=compute_dtype),
        out_shape=jax.ShapeDtypeStruct((B_pad, 2 * C), jnp.float32),
        grid_spec=pltpu.PrefetchScalarGridSpec(
            num_scalar_prefetch=0,
            grid=(nb,),
            in_specs=in_specs,
            out_specs=out_spec),
        compiler_params=pltpu.CompilerParams(
            dimension_semantics=("parallel",),   # shards batch tiles across v7x's 2 TCs
            vmem_limit_bytes=vmem_limit,
        ),
    )(*kernel_args)

    logits = packed[:B, :C]
    probs = packed[:B, C:]
    return logits, probs


def reference_forward(x, params, temperature=1.0, eps=1e-5):
    h = x
    for i in range(1, 5):
        h = h @ params[f"fc{i}_w"].T + params[f"fc{i}_b"]
        scale = params[f"bn{i}_gamma"] * jax.lax.rsqrt(params[f"bn{i}_var"] + eps)
        shift = params[f"bn{i}_beta"] - params[f"bn{i}_mean"] * scale
        h = jnp.maximum(h * scale + shift, 0.0)
    logits = h @ params["fc5_w"].T + params["fc5_b"]
    probs = jax.nn.softmax(logits / temperature, axis=1)
    return logits, probs


if __name__ == "__main__":
    input_dim, num_classes = 16, 4
    key = jax.random.PRNGKey(0)
    k_x, k_p, k_x2 = jax.random.split(key, 3)
    params = init_params(k_p, input_dim, num_classes)

    # --- small single-tile test (B=8), f32 path --------------------------------
    B = 8
    x = jax.random.normal(k_x, (B, input_dim), jnp.float32)
    ref_logits, ref_probs = reference_forward(x, params, temperature=1.0)

    logits, probs = beans_forward(x, params, num_classes, temperature=1.0)
    jax.block_until_ready((logits, probs))
    assert logits.shape == (B, num_classes) and probs.shape == (B, num_classes)
    assert jnp.allclose(logits, ref_logits, atol=1e-4, rtol=1e-4)
    assert jnp.allclose(probs, ref_probs, atol=1e-4, rtol=1e-4)
    assert jnp.allclose(jnp.sum(probs, axis=1), 1.0, atol=1e-5)

    # --- bf16 MXU path (v6e/v7x datapath) — looser tolerance for bf16 rounding --
    logits_bf, probs_bf = beans_forward(
        x, params, num_classes, temperature=1.0, compute_dtype=jnp.bfloat16)
    jax.block_until_ready((logits_bf, probs_bf))
    assert jnp.allclose(logits_bf, ref_logits, atol=7e-2, rtol=7e-2)
    assert jnp.allclose(probs_bf, ref_probs, atol=5e-2, rtol=5e-2)
    assert jnp.allclose(jnp.sum(probs_bf, axis=1), 1.0, atol=1e-3)

    # --- multi-tile + tail-padding test (grid > 1, B not a multiple of tile_b) --
    B2 = 333
    x2 = jax.random.normal(k_x2, (B2, input_dim), jnp.float32)
    ref_logits2, ref_probs2 = reference_forward(x2, params, temperature=2.0)
    logits2, probs2 = beans_forward(
        x2, params, num_classes, temperature=2.0, max_tile_b=128)
    jax.block_until_ready((logits2, probs2))
    assert logits2.shape == (B2, num_classes) and probs2.shape == (B2, num_classes)
    assert jnp.allclose(logits2, ref_logits2, atol=1e-4, rtol=1e-4)
    assert jnp.allclose(probs2, ref_probs2, atol=1e-4, rtol=1e-4)
    assert jnp.allclose(jnp.sum(probs2, axis=1), 1.0, atol=1e-5)

    print("KERNEL_OK")
</pallas_src>

<mosaic_0001>
module attributes {stable_mosaic.version = 11 : i64} {
  func.func @_beans_kernel(%arg0: i32, %arg1: memref<8x16xf32, #tpu.memory_space<vmem>>, %arg2: memref<16x128xf32, #tpu.memory_space<vmem>>, %arg3: memref<1x128xf32, #tpu.memory_space<vmem>>, %arg4: memref<128x64xf32, #tpu.memory_space<vmem>>, %arg5: memref<1x64xf32, #tpu.memory_space<vmem>>, %arg6: memref<64x32xf32, #tpu.memory_space<vmem>>, %arg7: memref<1x32xf32, #tpu.memory_space<vmem>>, %arg8: memref<32x16xf32, #tpu.memory_space<vmem>>, %arg9: memref<1x16xf32, #tpu.memory_space<vmem>>, %arg10: memref<16x4xf32, #tpu.memory_space<vmem>>, %arg11: memref<1x4xf32, #tpu.memory_space<vmem>>, %arg12: memref<8x8xf32, #tpu.memory_space<vmem>>) attributes {dimension_semantics = [#tpu.dimension_semantics<parallel>], iteration_bounds = array<i64: 1>, scalar_prefetch = 0 : i64, scratch_operands = 0 : i64, tpu.core_type = #tpu.core_type<tc>, window_params = [{transform_indices = @transform_0, window_bounds = array<i64: 8, 16>}, {pipeline_mode = #tpu.pipeline_mode<synchronous>, transform_indices = @transform_1, window_bounds = array<i64: 16, 128>}, {pipeline_mode = #tpu.pipeline_mode<synchronous>, transform_indices = @transform_2, window_bounds = array<i64: 1, 128>}, {pipeline_mode = #tpu.pipeline_mode<synchronous>, transform_indices = @transform_3, window_bounds = array<i64: 128, 64>}, {pipeline_mode = #tpu.pipeline_mode<synchronous>, transform_indices = @transform_4, window_bounds = array<i64: 1, 64>}, {pipeline_mode = #tpu.pipeline_mode<synchronous>, transform_indices = @transform_5, window_bounds = array<i64: 64, 32>}, {pipeline_mode = #tpu.pipeline_mode<synchronous>, transform_indices = @transform_6, window_bounds = array<i64: 1, 32>}, {pipeline_mode = #tpu.pipeline_mode<synchronous>, transform_indices = @transform_7, window_bounds = array<i64: 32, 16>}, {pipeline_mode = #tpu.pipeline_mode<synchronous>, transform_indices = @transform_8, window_bounds = array<i64: 1, 16>}, {pipeline_mode = #tpu.pipeline_mode<synchronous>, transform_indices = @transform_9, window_bounds = array<i64: 16, 4>}, {pipeline_mode = #tpu.pipeline_mode<synchronous>, transform_indices = @transform_10, window_bounds = array<i64: 1, 4>}, {transform_indices = @transform_11, window_bounds = array<i64: 8, 8>}]} {
    %c0 = arith.constant 0 : index
    %c0_0 = arith.constant 0 : index
    %0 = vector.load %arg1[%c0, %c0_0] : memref<8x16xf32, #tpu.memory_space<vmem>>, vector<8x16xf32>
    %c0_1 = arith.constant 0 : index
    %c0_2 = arith.constant 0 : index
    %1 = vector.load %arg2[%c0_1, %c0_2] : memref<16x128xf32, #tpu.memory_space<vmem>>, vector<16x128xf32>
    %cst = arith.constant dense<0.000000e+00> : vector<8x128xf32>
    %2 = tpu.matmul %0, %1, %cst {dimension_numbers = #tpu.dot_dimension_numbers<[1], [0], [0], [1], [0, 0, 1, 1], [], []>} : vector<8x16xf32>, vector<16x128xf32>, vector<8x128xf32> -> vector<8x128xf32>
    %c0_3 = arith.constant 0 : index
    %c0_4 = arith.constant 0 : index
    %3 = vector.load %arg3[%c0_3, %c0_4] : memref<1x128xf32, #tpu.memory_space<vmem>>, vector<1x128xf32>
    %4 = vector.broadcast %3 : vector<1x128xf32> to vector<8x128xf32>
    %5 = arith.addf %2, %4 : vector<8x128xf32>
    %cst_5 = arith.constant 0.000000e+00 : f32
    %6 = vector.broadcast %cst_5 : f32 to vector<8x128xf32>
    %7 = arith.maximumf %5, %6 : vector<8x128xf32>
    %c0_6 = arith.constant 0 : index
    %c0_7 = arith.constant 0 : index
    %8 = vector.load %arg4[%c0_6, %c0_7] : memref<128x64xf32, #tpu.memory_space<vmem>>, vector<128x64xf32>
    %cst_8 = arith.constant dense<0.000000e+00> : vector<8x64xf32>
    %9 = tpu.matmul %7, %8, %cst_8 {dimension_numbers = #tpu.dot_dimension_numbers<[1], [0], [0], [1], [0, 0, 1, 1], [], []>} : vector<8x128xf32>, vector<128x64xf32>, vector<8x64xf32> -> vector<8x64xf32>
    %c0_9 = arith.constant 0 : index
    %c0_10 = arith.constant 0 : index
    %10 = vector.load %arg5[%c0_9, %c0_10] : memref<1x64xf32, #tpu.memory_space<vmem>>, vector<1x64xf32>
    %11 = vector.broadcast %10 : vector<1x64xf32> to vector<8x64xf32>
    %12 = arith.addf %9, %11 : vector<8x64xf32>
    %cst_11 = arith.constant 0.000000e+00 : f32
    %13 = vector.broadcast %cst_11 : f32 to vector<8x64xf32>
    %14 = arith.maximumf %12, %13 : vector<8x64xf32>
    %c0_12 = arith.constant 0 : index
    %c0_13 = arith.constant 0 : index
    %15 = vector.load %arg6[%c0_12, %c0_13] : memref<64x32xf32, #tpu.memory_space<vmem>>, vector<64x32xf32>
    %cst_14 = arith.constant dense<0.000000e+00> : vector<8x32xf32>
    %16 = tpu.matmul %14, %15, %cst_14 {dimension_numbers = #tpu.dot_dimension_numbers<[1], [0], [0], [1], [0, 0, 1, 1], [], []>} : vector<8x64xf32>, vector<64x32xf32>, vector<8x32xf32> -> vector<8x32xf32>
    %c0_15 = arith.constant 0 : index
    %c0_16 = arith.constant 0 : index
    %17 = vector.load %arg7[%c0_15, %c0_16] : memref<1x32xf32, #tpu.memory_space<vmem>>, vector<1x32xf32>
    %18 = vector.broadcast %17 : vector<1x32xf32> to vector<8x32xf32>
    %19 = arith.addf %16, %18 : vector<8x32xf32>
    %cst_17 = arith.constant 0.000000e+00 : f32
    %20 = vector.broadcast %cst_17 : f32 to vector<8x32xf32>
    %21 = arith.maximumf %19, %20 : vector<8x32xf32>
    %c0_18 = arith.constant 0 : index
    %c0_19 = arith.constant 0 : index
    %22 = vector.load %arg8[%c0_18, %c0_19] : memref<32x16xf32, #tpu.memory_space<vmem>>, vector<32x16xf32>
    %cst_20 = arith.constant dense<0.000000e+00> : vector<8x16xf32>
    %23 = tpu.matmul %21, %22, %cst_20 {dimension_numbers = #tpu.dot_dimension_numbers<[1], [0], [0], [1], [0, 0, 1, 1], [], []>} : vector<8x32xf32>, vector<32x16xf32>, vector<8x16xf32> -> vector<8x16xf32>
    %c0_21 = arith.constant 0 : index
    %c0_22 = arith.constant 0 : index
    %24 = vector.load %arg9[%c0_21, %c0_22] : memref<1x16xf32, #tpu.memory_space<vmem>>, vector<1x16xf32>
    %25 = vector.broadcast %24 : vector<1x16xf32> to vector<8x16xf32>
    %26 = arith.addf %23, %25 : vector<8x16xf32>
    %cst_23 = arith.constant 0.000000e+00 : f32
    %27 = vector.broadcast %cst_23 : f32 to vector<8x16xf32>
    %28 = arith.maximumf %26, %27 : vector<8x16xf32>
    %c0_24 = arith.constant 0 : index
    %c0_25 = arith.constant 0 : index
    %29 = vector.load %arg10[%c0_24, %c0_25] : memref<16x4xf32, #tpu.memory_space<vmem>>, vector<16x4xf32>
    %cst_26 = arith.constant dense<0.000000e+00> : vector<8x4xf32>
    %30 = tpu.matmul %28, %29, %cst_26 {dimension_numbers = #tpu.dot_dimension_numbers<[1], [0], [0], [1], [0, 0, 1, 1], [], []>} : vector<8x16xf32>, vector<16x4xf32>, vector<8x4xf32> -> vector<8x4xf32>
    %c0_27 = arith.constant 0 : index
    %c0_28 = arith.constant 0 : index
    %31 = vector.load %arg11[%c0_27, %c0_28] : memref<1x4xf32, #tpu.memory_space<vmem>>, vector<1x4xf32>
    %32 = vector.broadcast %31 : vector<1x4xf32> to vector<8x4xf32>
    %33 = arith.addf %30, %32 : vector<8x4xf32>
    %cst_29 = arith.constant 1.000000e+00 : f32
    %34 = vector.broadcast %cst_29 : f32 to vector<8x4xf32>
    %35 = arith.mulf %33, %34 : vector<8x4xf32>
    %cst_30 = arith.constant dense<0xFF800000> : vector<8xf32>
    %36 = vector.multi_reduction <maximumf>, %35, %cst_30 [1] : vector<8x4xf32> to vector<8xf32>
    %37 = vector.shape_cast %36 : vector<8xf32> to vector<8x1xf32>
    %38 = vector.broadcast %37 : vector<8x1xf32> to vector<8x4xf32>
    %39 = arith.subf %35, %38 : vector<8x4xf32>
    %40 = math.exp %39 : vector<8x4xf32>
    %cst_31 = arith.constant dense<0.000000e+00> : vector<8xf32>
    %41 = vector.multi_reduction <add>, %40, %cst_31 [1] : vector<8x4xf32> to vector<8xf32>
    %42 = vector.shape_cast %41 : vector<8xf32> to vector<8x1xf32>
    %43 = vector.broadcast %42 : vector<8x1xf32> to vector<8x4xf32>
    %44 = arith.divf %40, %43 : vector<8x4xf32>
    %45 = tpu.concatenate %33, %44 in 1 : vector<8x4xf32>, vector<8x4xf32> -> vector<8x8xf32>
    %c0_32 = arith.constant 0 : index
    %c0_33 = arith.constant 0 : index
    %46 = vector.load %arg12[%c0_32, %c0_33] : memref<8x8xf32, #tpu.memory_space<vmem>>, vector<8x8xf32>
    tpu.vector_store %arg12[%c0_32, %c0_33], %45 {strides = array<i32>} : memref<8x8xf32, #tpu.memory_space<vmem>>, vector<8x8xf32>,
    return
  }
  func.func @transform_0(%arg0: i32) -> (i32, i32) {
    %c0_i32 = arith.constant 0 : i32
    %c0_i32_0 = arith.constant 0 : i32
    return %arg0, %c0_i32 : i32, i32
  }
  func.func @transform_1(%arg0: i32) -> (i32, i32) {
    %c0_i32 = arith.constant 0 : i32
    %c0_i32_0 = arith.constant 0 : i32
    %c0_i32_1 = arith.constant 0 : i32
    return %c0_i32, %c0_i32_0 : i32, i32
  }
  func.func @transform_2(%arg0: i32) -> (i32, i32) {
    %c0_i32 = arith.constant 0 : i32
    %c0_i32_0 = arith.constant 0 : i32
    %c0_i32_1 = arith.constant 0 : i32
    return %c0_i32, %c0_i32_0 : i32, i32
  }
  func.func @transform_3(%arg0: i32) -> (i32, i32) {
    %c0_i32 = arith.constant 0 : i32
    %c0_i32_0 = arith.constant 0 : i32
    %c0_i32_1 = arith.constant 0 : i32
    return %c0_i32, %c0_i32_0 : i32, i32
  }
  func.func @transform_4(%arg0: i32) -> (i32, i32) {
    %c0_i32 = arith.constant 0 : i32
    %c0_i32_0 = arith.constant 0 : i32
    %c0_i32_1 = arith.constant 0 : i32
    return %c0_i32, %c0_i32_0 : i32, i32
  }
  func.func @transform_5(%arg0: i32) -> (i32, i32) {
    %c0_i32 = arith.constant 0 : i32
    %c0_i32_0 = arith.constant 0 : i32
    %c0_i32_1 = arith.constant 0 : i32
    return %c0_i32, %c0_i32_0 : i32, i32
  }
  func.func @transform_6(%arg0: i32) -> (i32, i32) {
    %c0_i32 = arith.constant 0 : i32
    %c0_i32_0 = arith.constant 0 : i32
    %c0_i32_1 = arith.constant 0 : i32
    return %c0_i32, %c0_i32_0 : i32, i32
  }
  func.func @transform_7(%arg0: i32) -> (i32, i32) {
    %c0_i32 = arith.constant 0 : i32
    %c0_i32_0 = arith.constant 0 : i32
    %c0_i32_1 = arith.constant 0 : i32
    return %c0_i32, %c0_i32_0 : i32, i32
  }
  func.func @transform_8(%arg0: i32) -> (i32, i32) {
    %c0_i32 = arith.constant 0 : i32
    %c0_i32_0 = arith.constant 0 : i32
    %c0_i32_1 = arith.constant 0 : i32
    return %c0_i32, %c0_i32_0 : i32, i32
  }
  func.func @transform_9(%arg0: i32) -> (i32, i32) {
    %c0_i32 = arith.constant 0 : i32
    %c0_i32_0 = arith.constant 0 : i32
    %c0_i32_1 = arith.constant 0 : i32
    return %c0_i32, %c0_i32_0 : i32, i32
  }
  func.func @transform_10(%arg0: i32) -> (i32, i32) {
    %c0_i32 = arith.constant 0 : i32
    %c0_i32_0 = arith.constant 0 : i32
    %c0_i32_1 = arith.constant 0 : i32
    return %c0_i32, %c0_i32_0 : i32, i32
  }
  func.func @transform_11(%arg0: i32) -> (i32, i32) {
    %c0_i32 = arith.constant 0 : i32
    %c0_i32_0 = arith.constant 0 : i32
    return %arg0, %c0_i32 : i32, i32
  }
}

</mosaic_0001>

<bundles_post_ra>
// kernel: tpu_custom_call.1
= control target key start
LH: loop header
LB: loop body
LE: loop exit
PB: predicated region body
PF: predicated region fallthrough
CT: control target
= control target key end

     0   :  { %v664_v1 = vmov 0.0   ;;  %vm665_vm0 = vmmov 0   ;;  %vm49_vm1 = vcmask 130048   ;;  %s892_s0 = inlined_call_operand.vmem [shape: f32[8,16], index: 0, kind: input, shape index: {}]   ;;  %s893_s1 = inlined_call_operand.vmem [shape: f32[16,128], index: 1, kind: input, shape index: {}]   ;;  %s894_s2 = inlined_call_operand.vmem [shape: f32[1,128], index: 2, kind: input, shape index: {}]   ;;  %s895_s3 = inlined_call_operand.vmem [shape: f32[128,64], index: 3, kind: input, shape index: {}]   ;;  %s896_s4 = inlined_call_operand.vmem [shape: f32[1,64], index: 4, kind: input, shape index: {}]   ;;  %s897_s5 = inlined_call_operand.vmem [shape: f32[64,32], index: 5, kind: input, shape index: {}]   ;;  %s898_s6 = inlined_call_operand.vmem [shape: f32[1,32], index: 6, kind: input, shape index: {}]   ;;  %s899_s7 = inlined_call_operand.vmem [shape: f32[32,16], index: 7, kind: input, shape index: {}]   ;;  %s900_s8 = inlined_call_operand.vmem [shape: f32[1,16], index: 8, kind: input, shape index: {}]   ;;  %s901_s9 = inlined_call_operand.vmem [shape: f32[16,4], index: 9, kind: input, shape index: {}]   ;;  %s902_s10 = inlined_call_operand.vmem [shape: f32[1,4], index: 10, kind: input, shape index: {}]   ;;  %s903_s11 = inlined_call_operand.hbm [shape: f32[8,8], index: 11, kind: output, shape index: {}]  }
   0x1   :  { %v41_v0 = vld [vmem:[%s893_s1 + $0x8] sm:$0xff]  ;;  %555 = vmatprep.subr.mxu0 %v664_v1  ;;  %v40_v2 = vld [vmem:[%s893_s1] sm:$0xff]  ;;  %559 = vmatprep.mubr.msk.f32.mxu0 %vm665_vm0, %v664_v1  ;;  %v139_v3 = vld [vmem:[%s895_s3 + $0x78] sm:$0xff] }
   0x2   :  { %556 = vmatpush3.msra.mxu0 %v41_v0  ;;  %v39_v4 = vld [vmem:[%s892_s0] sm:$0xff]  ;;  %562 = vmatprep.subr.mxu1 %v664_v1  ;;  %v138_v5 = vld [vmem:[%s895_s3 + $0x70] sm:$0xff]  ;;  %v137_v6 = vld [vmem:[%s895_s3 + $0x68] sm:$0xff] }
   0x3   :  { %557 = vmatprep.subr.mxu0 %v664_v1  ;;  %563 = vmatpush3.msra.mxu1 %v139_v3 }
   0x4   :  { %558 = vmatpush3.msra.mxu0 %v40_v2  ;;  %564 = vmatprep.subr.mxu1 %v664_v1 }
   0x5   :  { %560 = vmatmul.mubr.msk.f32.vlgmr.msra.gmra.mxu0 %vm49_vm1, %v39_v4  ;;  %565 = vmatpush3.msra.mxu1 %v138_v5 }
   0x6   :  { %16 = vsyncpa [#allocation3], 0  ;;  %566 = vmatprep.subr.mxu1 %v664_v1  ;;  %v136_v7 = vld [vmem:[%s895_s3 + $0x60] sm:$0xff]  ;;  %594 = vmatprep.mubr.msk.f32.mxu1 %vm665_vm0, %v664_v1  ;;  %v135_v8 = vld [vmem:[%s895_s3 + $0x58] sm:$0xff]  ;;  %vm233_vm2 = vcmask 523264   ;;  %vm319_vm3 = vcmask 261120  }
   0x7   :  { %567 = vmatpush3.msra.mxu1 %v137_v6  ;;  %597 = vmatprep.subr.mxu0 %v664_v1  ;;  %v134_v9 = vld [vmem:[%s895_s3 + $0x50] sm:$0xff]  ;;  %v133_v10 = vld [vmem:[%s895_s3 + $0x48] sm:$0xff]  ;;  %v132_v11 = vld [vmem:[%s895_s3 + $0x40] sm:$0xff]  ;;  %vm476_vm4 = vcmask 31744   ;;  %vm493_vm5 = vcmask 64512  }
   0x8   :  { %568 = vmatprep.subr.mxu1 %v664_v1  ;;  %613 = vmatprep.mubr.msk.f32.mxu0 %vm665_vm0, %v664_v1  ;;  %v131_v12 = vld [vmem:[%s895_s3 + $0x38] sm:$0xff]  ;;  %v130_v13 = vld [vmem:[%s895_s3 + $0x30] sm:$0xff]  ;;  %v129_v14 = vld [vmem:[%s895_s3 + $0x28] sm:$0xff] }
   0x9   :  { %569 = vmatpush3.msra.mxu1 %v136_v7  ;;  %v128_v15 = vld [vmem:[%s895_s3 + $0x20] sm:$0xff]  ;;  %v127_v16 = vld [vmem:[%s895_s3 + $0x18] sm:$0xff]  ;;  %v126_v17 = vld [vmem:[%s895_s3 + $0x10] sm:$0xff] }
   0xa   :  { %570 = vmatprep.subr.mxu1 %v664_v1  ;;  %v125_v18 = vld [vmem:[%s895_s3 + $0x8] sm:$0xff]  ;;  %v124_v19 = vld [vmem:[%s895_s3] sm:$0xff]  ;;  %v225_v20 = vld [vmem:[%s897_s5 + $0x38] sm:$0xff] }
   0xb   :  { %571 = vmatpush3.msra.mxu1 %v135_v8  ;;  %v224_v21 = vld [vmem:[%s897_s5 + $0x30] sm:$0xff]  ;;  %598 = vmatpush3.msra.mxu0 %v225_v20  ;;  %v223_v22 = vld [vmem:[%s897_s5 + $0x28] sm:$0xff]  ;;  %v222_v23 = vld [vmem:[%s897_s5 + $0x20] sm:$0xff] }
   0xc   :  { %572 = vmatprep.subr.mxu1 %v664_v1  ;;  %599 = vmatprep.subr.mxu0 %v664_v1  ;;  %v221_v24 = vld [vmem:[%s897_s5 + $0x18] sm:$0xff]  ;;  %v509_v25 = vld [vmem:[%s894_s2] ss:$0 sm:$0xff]  ;;  %v220_v30 = vld [vmem:[%s897_s5 + $0x10] sm:$0xff] }
   0xd   :  { %573 = vmatpush3.msra.mxu1 %v134_v9  ;;  %600 = vmatpush3.msra.mxu0 %v224_v21  ;;  %v219_v31 = vld [vmem:[%s897_s5 + $0x8] sm:$0xff]  ;;  %v218_v32 = vld [vmem:[%s897_s5] sm:$0xff]  ;;  %v311_v38 = vld [vmem:[%s899_s7 + $0x18] sm:$0xff] }
   0xe   :  { %574 = vmatprep.subr.mxu1 %v664_v1  ;;  %601 = vmatprep.subr.mxu0 %v664_v1  ;;  %v511_v33 = vld [vmem:[%s896_s4] ss:$0 sm:$0xff]  ;;  %v310_v39 = vld [vmem:[%s899_s7 + $0x10] sm:$0xff]  ;;  %v309_v40 = vld [vmem:[%s899_s7 + $0x8] sm:$0xff] }
   0xf   :  { %575 = vmatpush3.msra.mxu1 %v133_v10  ;;  %602 = vmatpush3.msra.mxu0 %v223_v22  ;;  %v308_v41 = vld [vmem:[%s899_s7] sm:$0xff]  ;;  %v395_v47 = vld [vmem:[%s901_s9 + $0x8] sm:$0xff] }
  0x10   :  { %576 = vmatprep.subr.mxu1 %v664_v1  ;;  %603 = vmatprep.subr.mxu0 %v664_v1  ;;  %v512_v42 = vld [vmem:[%s898_s6] ss:$0 sm:$0xff] }
  0x11   :  { %577 = vmatpush3.msra.mxu1 %v132_v11  ;;  %604 = vmatpush3.msra.mxu0 %v222_v23  ;;  %v394_v48 = vld [vmem:[%s901_s9] sm:$0xff]  ;;  %s667_s9 = smov [#allocation2]  }
  0x12   :  { %578 = vmatprep.subr.mxu1 %v664_v1  ;;  %605 = vmatprep.subr.mxu0 %v664_v1  ;;  %v514_v49 = vld [vmem:[%s900_s8] ss:$0 sm:$0xff]  ;;  %s666_s8 = smov 4  }
  0x13   :  { %579 = vmatpush3.msra.mxu1 %v131_v12  ;;  %606 = vmatpush3.msra.mxu0 %v221_v24  ;;  %v516_v54 = vld [vmem:[%s902_s10] ss:$0 sm:$0xff]  ;;  %s501_s10 = sshll.u32 %s667_s9, 4  ;;  %s502_s10 = int_to_ptr.vmem [resolvable:$true] %s501_s10 }
  0x14   :  { %580 = vmatprep.subr.mxu1 %v664_v1  ;;  %607 = vmatprep.subr.mxu0 %v664_v1  ;;  %s642_s23 = scalar_lea.vmem %s502_s10, 128  ;;  %p647_p1 = scmp.lt.s32.totalorder %s502_s10, %s502_s10 }
  0x15   :  { %581 = vmatpush3.msra.mxu1 %v130_v13  ;;  %608 = vmatpush3.msra.mxu0 %v220_v30  ;;  %p643_p0 = scmp.ne.s32.totalorder %s502_s10, %s642_s23  ;;  %p648_p2 = scmp.lt.s32.totalorder %s642_s23, %s642_s23 }
  0x16   :  { %582 = vmatprep.subr.mxu1 %v664_v1  ;;  %609 = vmatprep.subr.mxu0 %v664_v1 }
  0x17   :  { %583 = vmatpush3.msra.mxu1 %v129_v14  ;;  %610 = vmatpush3.msra.mxu0 %v219_v31  ;;  %p649_p3 = por %p648_p2, %p647_p1 }
  0x18   :  { %584 = vmatprep.subr.mxu1 %v664_v1  ;;  %611 = vmatprep.subr.mxu0 %v664_v1 }
  0x19   :  { %585 = vmatpush3.msra.mxu1 %v128_v15  ;;  %612 = vmatpush3.msra.mxu0 %v218_v32  ;;  %p650_p4 = pnand %p649_p3, %p643_p0 }
  0x1a   :  { %586 = vmatprep.subr.mxu1 %v664_v1  ;;  %616 = vmatprep.subr.mxu0 %v664_v1 }
  0x1b   :  { %587 = vmatpush3.msra.mxu1 %v127_v16 }
  0x1c   :  { %588 = vmatprep.subr.mxu1 %v664_v1 }
  0x1d   :  { %589 = vmatpush3.msra.mxu1 %v126_v17 }
  0x1e   :  { %590 = vmatprep.subr.mxu1 %v664_v1 }
  0x1f   :  { %591 = vmatpush3.msra.mxu1 %v125_v18 }
  0x20   :  { %592 = vmatprep.subr.mxu1 %v664_v1 }
  0x21   :  { %593 = vmatpush3.msra.mxu1 %v124_v19 }
  0xc5   :  { %v119_v26 = vpop.f32.mrf.mxu0 }
  0xc6   :  { %v120_v27 = vadd.f32 %v509_v25, %v119_v26 }
  0xc7   :  { %v561_v28 = vpop.f32.mrf.mxu0 }
  0xc8   :  { %v123_v29 = vmax.f32 %v120_v27, 0.0 }
  0xca   :  { %595 = vmatmul.mubr.f32.vlgmr.msra.gmra.mxu1 %v123_v29 }
 0x18a   :  { %v213_v34 = vpop.f32.mrf.mxu1 }
 0x18b   :  { %v214_v35 = vadd.f32 %v511_v33, %v213_v34 }
 0x18c   :  { %v596_v36 = vpop.f32.mrf.mxu1 }
 0x18d   :  { %v217_v37 = vmax.f32 %v214_v35, 0.0 }
 0x18f   :  { %614 = vmatmul.mubr.msk.f32.vlgmr.msra.gmra.mxu0 %vm233_vm2, %v217_v37 }
 0x190   :  { %617 = vmatpush3.msra.mxu0 %v311_v38  ;;  %624 = vmatprep.mubr.msk.f32.mxu0 %vm665_vm0, %v664_v1 }
 0x191   :  { %618 = vmatprep.subr.mxu0 %v664_v1 }
 0x192   :  { %619 = vmatpush3.msra.mxu0 %v310_v39 }
 0x193   :  { %620 = vmatprep.subr.mxu0 %v664_v1 }
 0x194   :  { %621 = vmatpush3.msra.mxu0 %v309_v40 }
 0x195   :  { %622 = vmatprep.subr.mxu0 %v664_v1 }
 0x196   :  { %623 = vmatpush3.msra.mxu0 %v308_v41 }
 0x197   :  { %627 = vmatprep.subr.mxu0 %v664_v1 }
 0x24f   :  { %v303_v43 = vpop.f32.mrf.mxu0 }
 0x250   :  { %v304_v44 = vadd.f32 %v512_v42, %v303_v43 }
 0x251   :  { %v615_v45 = vpop.f32.mrf.mxu0 }
 0x252   :  { %v307_v46 = vmax.f32 %v304_v44, 0.0 }
 0x254   :  { %625 = vmatmul.mubr.msk.f32.vlgmr.msra.gmra.mxu0 %vm319_vm3, %v307_v46 }
 0x255   :  { %631 = vmatprep.mubr.msk.f32.mxu0 %vm665_vm0, %v664_v1  ;;  %628 = vmatpush3.msra.mxu0 %v395_v47 }
 0x256   :  { %629 = vmatprep.subr.mxu0 %v664_v1 }
 0x257   :  { %630 = vmatpush3.msra.mxu0 %v394_v48 }
 0x314   :  { %v389_v50 = vpop.f32.mrf.mxu0 }
 0x315   :  { %v390_v51 = vadd.f32 %v514_v49, %v389_v50 }
 0x316   :  { %v626_v52 = vpop.f32.mrf.mxu0 }
 0x317   :  { %v393_v53 = vmax.f32 %v390_v51, 0.0 }
 0x319   :  { %632 = vmatmul.mubr.msk.f32.vlgmr.msra.gmra.mxu0 %vm49_vm1, %v393_v53 }
 0x3d9   :  { %v472_v55 = vpop.f32.mrf.mxu0 }
 0x3da   :  { %v473_v56 = vadd.f32 %v516_v54, %v472_v55 }
 0x3db   :  { %v633_v57 = vpop.f32.mrf.mxu0 }
 0x3dc   :  { %v477_v58 = vsel %vm476_vm4, %v473_v56, -inf }
 0x3dd   :  { %478 = vmax.xlane.f32.xlu0 %v477_v58 }
 0x466   :  { %v479_v59 = vpop.xlane.xlu0 %478 }
 0x467   :  { %v480_v60 = vsub.f32 %v473_v56, %v479_v59 }
 0x469   :  { %v481_v61 = vmul.f32 1.442695, %v480_v60 }
 0x46b   :  { %638 = vpow2.f32 %v481_v61 }
 0x478   :  { %v639_v62 = vpop.eup %638 }
 0x479   :  { %v483_v63 = vsel %vm476_vm4, %v639_v62, 0.0 }
 0x47a   :  { %484 = vadd.xlane.f32.xlu0 %v483_v63 }
 0x503   :  { %v485_v0 = vpop.xlane.xlu0 %484 }
 0x504   :  { %640 = vrcp.f32 %v485_v0 }
 0x511   :  { %v641_v1 = vpop.eup %640 }
 0x512   :  { %v487_v2 = vmul.f32 %v641_v1, %v639_v62 }
 0x514   :  { %489 = vrot.lane.b32.xlu1 %v487_v2, %s666_s8 }
 0x586   :  { %v490_v3 = vpop.permute.xlu1 %489 }
 0x587   :  { %v492_v4 = vsel %vm476_vm4, %v473_v56, %v490_v3 }
 0x588   :  { %494 = vst.msk [vmem:[#allocation2] sm:$0xff] %vm493_vm5, %v492_v4 }
 0x589   :  { %653 = shalt.err (!%p650_p4)
}
 0x58a   :  { %504 = dma.vmem_to_hbm [thread:$0]  %s502_s10, 128, %s903_s11, [#allocation3]  }
 0x58b   :  { %662 = dma.done.wait [#allocation3], 128  }
 0x58c   :  { %663 = vsyncadd [#allocation3], 4294967168 }
 0x58d   :  { %508 = vsyncpa [#allocation3], 1 }

</bundles_post_ra>
